<compile_context>
chip_gen: v5e
topology: v5e:2x2
jax: 0.10.0
libtpu: 0.0.40
codegen_flags: <defaults>
</compile_context>

<pallas_src>
import jax
import jax.numpy as jnp
import numpy as np
from jax import lax
from jax.experimental import pallas as pl
from jax.experimental.pallas import tpu as pltpu

# ----- small, deterministic config consistent with the module -----
EMBED_DIM   = 32          # bert hidden size stand-in
POS_DIM     = 8
CLASS_SIZE  = 5
KERNEL_SIZE = 3
PADDING     = 1
HIDDEN      = 32          # conv out channels (before *3)
MAX_LEN     = 16          # sequence length == MaxPool1d window
BATCH       = 2
VOCAB       = 100
N_POS       = 2 * MAX_LEN

INPUT_DIM = EMBED_DIM + 2 * POS_DIM       # D = 48
L         = MAX_LEN
MINUS     = 1e-6

LANE      = 128                           # lane-dense logits width (>= CLASS_SIZE)
VOCAB_PAD = 128                           # lane-dense one-hot width for tokens


def pcnn_kernel(idx_ref, p1_ref, p2_ref, mid_ref,
                tok_proj_ref, p1_proj_ref, p2_proj_ref,
                bconv_ref, wlin_ref, blin_ref, out_ref):
    """Whole-batch PCNN hot path (single step, no grid, no scratch).

    idx_ref      : (B*L, 1) int32       token ids (BERT stand-in)
    p1_ref       : (B*L, 1) int32       pos1 ids
    p2_ref       : (B*L, 1) int32       pos2 ids
    mid_ref      : (B*L, 1) int32       piecewise-pool mask ids (0..3)
    tok_proj_ref : (K, VOCAB_PAD, H)    tok_table @ W_tok_k   (conv folded in)
    p1_proj_ref  : (K, N_POS, H)        pos1_table @ W_p1_k
    p2_proj_ref  : (K, N_POS, H)        pos2_table @ W_p2_k
    bconv_ref    : (1, H)               conv bias
    wlin_ref     : (3, H, LANE)         final linear, split per pool segment
    blin_ref     : (1, LANE)            final linear bias (zero-padded)
    out_ref      : (B, LANE)            lane-dense logits (first CLASS_SIZE valid)
    """
    BL = idx_ref.shape[0]
    B = BL // L
    H = bconv_ref.shape[1]

    # One-hot index matrices, built once and reused across the K taps.  Each
    # embedding gather is a (BL, V) @ (V, H) MXU matmul against a table that
    # already has the per-tap conv projection folded in.
    def onehot(ids_ref, v):
        ids = ids_ref[...]                                        # (BL, 1) int32
        cols = lax.broadcasted_iota(jnp.int32, (BL, v), 1)
        return jnp.where(ids == cols, 1.0, 0.0)                   # (BL, v) f32

    oh_tok = onehot(idx_ref, tok_proj_ref.shape[1])               # (BL, 128)
    oh_p1  = onehot(p1_ref,  p1_proj_ref.shape[1])                # (BL, 32)
    oh_p2  = onehot(p2_ref,  p2_proj_ref.shape[1])                # (BL, 32)

    def tap(k):                                                   # -> (BL, H)
        y = jnp.dot(oh_tok, tok_proj_ref[k], preferred_element_type=jnp.float32)
        y = y + jnp.dot(oh_p1, p1_proj_ref[k], preferred_element_type=jnp.float32)
        y = y + jnp.dot(oh_p2, p2_proj_ref[k], preferred_element_type=jnp.float32)
        return y

    y0, y1, y2 = tap(0), tap(1), tap(2)

    # padding=1 conv:  conv[l] = y0[l-1] + y1[l] + y2[l+1], zero at l=-1 / l=L.
    # The zero halo is realized with pltpu.roll (XLU) + edge masks; rolling the
    # flat (B*L, H) tensor is fine because the wrapped / cross-batch rows land
    # exactly on the masked sequence edges.
    l_pos = lax.broadcasted_iota(jnp.int32, (B, L, H), 1).reshape(BL, H)
    t0 = jnp.where(l_pos == 0,     0.0, pltpu.roll(y0, shift=1,      axis=0))
    t2 = jnp.where(l_pos == L - 1, 0.0, pltpu.roll(y2, shift=BL - 1, axis=0))
    conv = t0 + y1 + t2 + bconv_ref[...]                          # (BL, H)

    # Three masked ReLU max-pools + per-segment final-linear accumulation
    # (no 96-lane feature concat).  Additive mask == MINUS * (1 - mask_emb):
    # 0 where mask_id == segment+1, MINUS elsewhere.
    mid = mid_ref[...]                                            # (BL, 1) int32
    logits = blin_ref[...]                                        # (1, LANE), broadcasts
    for i in range(3):                                            # static unroll
        add = jnp.where(mid == i + 1, 0.0, MINUS)                 # (BL, 1)
        piece = jnp.maximum(conv + add, 0.0).reshape(B, L, H)     # (B, L, H)
        pool = jnp.tanh(jnp.max(piece, axis=1))                   # (B, H)
        logits = logits + jnp.dot(pool, wlin_ref[i],
                                  preferred_element_type=jnp.float32)
    out_ref[...] = logits


def prepare_kernel_params(params):
    """One-time weight prep, hoisted out of the jitted forward.

    The Conv1d is linear in the concatenated embeddings, so its per-tap weight
    slices are folded into the embedding tables: proj_k = table @ W_k^T.
    """
    E, P, H = EMBED_DIM, POS_DIM, HIDDEN
    conv_w = params["conv_w"]                                     # (H, D, K) torch layout
    tok_proj = jnp.einsum('ve,hek->kvh', params["tok_table"], conv_w[:, :E, :])
    p1_proj  = jnp.einsum('vp,hpk->kvh', params["pos1_table"], conv_w[:, E:E + P, :])
    p2_proj  = jnp.einsum('vp,hpk->kvh', params["pos2_table"], conv_w[:, E + P:, :])
    tok_proj = jnp.pad(tok_proj, ((0, 0), (0, VOCAB_PAD - VOCAB), (0, 0)))
    wlin = jnp.pad(params["lin_w"].T, ((0, 0), (0, LANE - CLASS_SIZE)))  # (3H, LANE)
    wlin = wlin.reshape(3, H, LANE)
    blin = jnp.pad(params["lin_b"], (0, LANE - CLASS_SIZE))[None, :]     # (1, LANE)
    bconv = params["conv_b"][None, :]                                    # (1, H)
    # TODO(synk): on v6e/v7x the tables/weights could be cast to bf16 (f32 MXU
    # accumulation) once batch is large enough to matter; kept f32 here so the
    # kernel matches the f32 reference on every chip generation (incl. v5e).
    return dict(tok_proj=tok_proj, p1_proj=p1_proj, p2_proj=p2_proj,
                bconv=bconv, wlin=wlin, blin=blin)


def pcnn_forward(kparams, data_index, pos1, pos2, mask_ids):
    """Full forward (inference branch): returns (predictions, logits)."""
    B = data_index.shape[0]
    flat = lambda a: a.reshape(B * L, 1)     # row-major bitcast, free for XLA

    vmem = pltpu.MemorySpace.VMEM
    logits_pad = pl.pallas_call(
        pcnn_kernel,
        out_shape=jax.ShapeDtypeStruct((B, LANE), jnp.float32),
        in_specs=[pl.BlockSpec(memory_space=vmem)] * 10,
        out_specs=pl.BlockSpec(memory_space=vmem),
        # TODO(synk): once BATCH grows, add a batch-tile grid axis with
        # dimension_semantics=("parallel",) so v7x's two TensorCores share it.
    )(flat(data_index), flat(pos1), flat(pos2), flat(mask_ids),
      kparams["tok_proj"], kparams["p1_proj"], kparams["p2_proj"],
      kparams["bconv"], kparams["wlin"], kparams["blin"])

    logits = logits_pad[:, :CLASS_SIZE]                  # (B, C)
    # dropout (eval) == identity; argmax is trivial glue outside the kernel
    return jnp.argmax(logits, axis=-1), logits


def reference_forward(params, data_index, pos1, pos2, mask_ids):
    """Pure-JAX reference mirroring the PyTorch forward exactly (NCW conv)."""
    B = data_index.shape[0]
    tok = params["tok_table"][data_index]
    p1  = params["pos1_table"][pos1]
    p2  = params["pos2_table"][pos2]
    x = jnp.concatenate([tok, p1, p2], axis=2)           # (B, L, D)
    x = jnp.transpose(x, (0, 2, 1))                      # (B, D, L)  NCW
    xp = jnp.pad(x, ((0, 0), (0, 0), (PADDING, PADDING)))
    conv = jnp.zeros((B, HIDDEN, L), jnp.float32)
    for k in range(KERNEL_SIZE):
        conv = conv + jnp.einsum('bdl,hd->bhl', xp[:, :, k:k + L],
                                 params["conv_w"][:, :, k])
    conv = conv + params["conv_b"][None, :, None]
    mask = 1.0 - jnp.transpose(params["mask_table"][mask_ids], (0, 2, 1))  # (B,3,L)
    pools = []
    for i in range(3):
        p = jnp.max(jax.nn.relu(conv + MINUS * mask[:, i:i + 1, :]), axis=2)
        pools.append(p)                                  # (B, H)
    feat = jnp.tanh(jnp.concatenate(pools, axis=1))      # (B, 3H)
    logits = feat @ params["lin_w"].T + params["lin_b"]
    return jnp.argmax(logits, axis=-1), logits


def init_params(key):
    ks = jax.random.split(key, 8)
    tok_table = 0.02 * jax.random.normal(ks[0], (VOCAB, EMBED_DIM), jnp.float32)
    pos1_table = 0.02 * jax.random.normal(ks[1], (N_POS, POS_DIM), jnp.float32)
    pos2_table = 0.02 * jax.random.normal(ks[2], (N_POS, POS_DIM), jnp.float32)
    pos1_table = pos1_table.at[0].set(0.0)   # padding_idx=0
    pos2_table = pos2_table.at[0].set(0.0)   # padding_idx=0
    conv_scale = 1.0 / float(np.sqrt(INPUT_DIM * KERNEL_SIZE))
    conv_w = conv_scale * jax.random.normal(
        ks[3], (HIDDEN, INPUT_DIM, KERNEL_SIZE), jnp.float32)   # PyTorch (H,D,K)
    conv_b = conv_scale * jax.random.normal(ks[4], (HIDDEN,), jnp.float32)
    lin_scale = 1.0 / float(np.sqrt(3 * HIDDEN))
    lin_w = lin_scale * jax.random.normal(ks[5], (CLASS_SIZE, 3 * HIDDEN),
                                          jnp.float32)          # PyTorch (C,3H)
    lin_b = lin_scale * jax.random.normal(ks[6], (CLASS_SIZE,), jnp.float32)
    mask_table = jnp.array([[0, 0, 0], [1, 0, 0], [0, 1, 0], [0, 0, 1]],
                           jnp.float32)                          # frozen masks
    return dict(tok_table=tok_table, pos1_table=pos1_table,
                pos2_table=pos2_table, conv_w=conv_w, conv_b=conv_b,
                lin_w=lin_w, lin_b=lin_b, mask_table=mask_table)


if __name__ == "__main__":
    key = jax.random.PRNGKey(0)
    kp, k1, k2, k3, k4 = jax.random.split(key, 5)
    params = init_params(kp)
    kparams = prepare_kernel_params(params)      # hoisted one-time weight prep

    data_index = jax.random.randint(k1, (BATCH, L), 0, VOCAB, jnp.int32)
    pos1 = jax.random.randint(k2, (BATCH, L), 0, N_POS, jnp.int32)
    pos2 = jax.random.randint(k3, (BATCH, L), 0, N_POS, jnp.int32)
    mask_ids = jax.random.randint(k4, (BATCH, L), 0, 4, jnp.int32)

    preds, logits = jax.jit(pcnn_forward)(kparams, data_index, pos1, pos2,
                                          mask_ids)
    jax.block_until_ready((preds, logits))

    ref_preds, ref_logits = reference_forward(params, data_index, pos1, pos2,
                                              mask_ids)
    np.testing.assert_allclose(np.asarray(logits), np.asarray(ref_logits),
                               rtol=1e-4, atol=1e-4)
    assert np.array_equal(np.asarray(preds), np.asarray(ref_preds))

    print("KERNEL_OK")
</pallas_src>

<mosaic_0001>
module attributes {stable_mosaic.version = 11 : i64} {
  func.func @pcnn_kernel(%arg0: memref<32x1xi32, #tpu.memory_space<vmem>>, %arg1: memref<32x1xi32, #tpu.memory_space<vmem>>, %arg2: memref<32x1xi32, #tpu.memory_space<vmem>>, %arg3: memref<32x1xi32, #tpu.memory_space<vmem>>, %arg4: memref<3x128x32xf32, #tpu.memory_space<vmem>>, %arg5: memref<3x32x32xf32, #tpu.memory_space<vmem>>, %arg6: memref<3x32x32xf32, #tpu.memory_space<vmem>>, %arg7: memref<1x32xf32, #tpu.memory_space<vmem>>, %arg8: memref<3x32x128xf32, #tpu.memory_space<vmem>>, %arg9: memref<1x128xf32, #tpu.memory_space<vmem>>, %arg10: memref<2x128xf32, #tpu.memory_space<vmem>>) attributes {dimension_semantics = [], scalar_prefetch = 0 : i64, scratch_operands = 0 : i64, tpu.core_type = #tpu.core_type<tc>} {
    %c0 = arith.constant 0 : index
    %c0_0 = arith.constant 0 : index
    %0 = vector.load %arg0[%c0, %c0_0] : memref<32x1xi32, #tpu.memory_space<vmem>>, vector<32x1xi32>
    %1 = tpu.iota {dimensions = array<i32: 1>} : vector<32x128xi32>
    %2 = vector.broadcast %0 : vector<32x1xi32> to vector<32x128xi32>
    %3 = arith.cmpi eq, %2, %1 : vector<32x128xi32>
    %cst = arith.constant 1.000000e+00 : f32
    %cst_1 = arith.constant 0.000000e+00 : f32
    %4 = vector.broadcast %cst : f32 to vector<32x128xf32>
    %5 = vector.broadcast %cst_1 : f32 to vector<32x128xf32>
    %6 = arith.select %3, %4, %5 : vector<32x128xi1>, vector<32x128xf32>
    %c0_2 = arith.constant 0 : index
    %c0_3 = arith.constant 0 : index
    %7 = vector.load %arg1[%c0_2, %c0_3] : memref<32x1xi32, #tpu.memory_space<vmem>>, vector<32x1xi32>
    %8 = tpu.iota {dimensions = array<i32: 1>} : vector<32x32xi32>
    %9 = vector.broadcast %7 : vector<32x1xi32> to vector<32x32xi32>
    %10 = arith.cmpi eq, %9, %8 : vector<32x32xi32>
    %cst_4 = arith.constant 1.000000e+00 : f32
    %cst_5 = arith.constant 0.000000e+00 : f32
    %11 = vector.broadcast %cst_4 : f32 to vector<32x32xf32>
    %12 = vector.broadcast %cst_5 : f32 to vector<32x32xf32>
    %13 = arith.select %10, %11, %12 : vector<32x32xi1>, vector<32x32xf32>
    %c0_6 = arith.constant 0 : index
    %c0_7 = arith.constant 0 : index
    %14 = vector.load %arg2[%c0_6, %c0_7] : memref<32x1xi32, #tpu.memory_space<vmem>>, vector<32x1xi32>
    %15 = tpu.iota {dimensions = array<i32: 1>} : vector<32x32xi32>
    %16 = vector.broadcast %14 : vector<32x1xi32> to vector<32x32xi32>
    %17 = arith.cmpi eq, %16, %15 : vector<32x32xi32>
    %cst_8 = arith.constant 1.000000e+00 : f32
    %cst_9 = arith.constant 0.000000e+00 : f32
    %18 = vector.broadcast %cst_8 : f32 to vector<32x32xf32>
    %19 = vector.broadcast %cst_9 : f32 to vector<32x32xf32>
    %20 = arith.select %17, %18, %19 : vector<32x32xi1>, vector<32x32xf32>
    %c0_10 = arith.constant 0 : index
    %c0_11 = arith.constant 0 : index
    %c0_12 = arith.constant 0 : index
    %21 = vector.load %arg4[%c0_10, %c0_11, %c0_12] : memref<3x128x32xf32, #tpu.memory_space<vmem>>, vector<1x128x32xf32>
    %22 = vector.shape_cast %21 : vector<1x128x32xf32> to vector<128x32xf32>
    %cst_13 = arith.constant dense<0.000000e+00> : vector<32x32xf32>
    %23 = tpu.matmul %6, %22, %cst_13 {dimension_numbers = #tpu.dot_dimension_numbers<[1], [0], [0], [1], [0, 0, 1, 1], [], []>} : vector<32x128xf32>, vector<128x32xf32>, vector<32x32xf32> -> vector<32x32xf32>
    %c0_14 = arith.constant 0 : index
    %c0_15 = arith.constant 0 : index
    %c0_16 = arith.constant 0 : index
    %24 = vector.load %arg5[%c0_14, %c0_15, %c0_16] : memref<3x32x32xf32, #tpu.memory_space<vmem>>, vector<1x32x32xf32>
    %25 = vector.shape_cast %24 : vector<1x32x32xf32> to vector<32x32xf32>
    %cst_17 = arith.constant dense<0.000000e+00> : vector<32x32xf32>
    %26 = tpu.matmul %13, %25, %cst_17 {dimension_numbers = #tpu.dot_dimension_numbers<[1], [0], [0], [1], [0, 0, 1, 1], [], []>} : vector<32x32xf32>, vector<32x32xf32>, vector<32x32xf32> -> vector<32x32xf32>
    %27 = arith.addf %23, %26 : vector<32x32xf32>
    %c0_18 = arith.constant 0 : index
    %c0_19 = arith.constant 0 : index
    %c0_20 = arith.constant 0 : index
    %28 = vector.load %arg6[%c0_18, %c0_19, %c0_20] : memref<3x32x32xf32, #tpu.memory_space<vmem>>, vector<1x32x32xf32>
    %29 = vector.shape_cast %28 : vector<1x32x32xf32> to vector<32x32xf32>
    %cst_21 = arith.constant dense<0.000000e+00> : vector<32x32xf32>
    %30 = tpu.matmul %20, %29, %cst_21 {dimension_numbers = #tpu.dot_dimension_numbers<[1], [0], [0], [1], [0, 0, 1, 1], [], []>} : vector<32x32xf32>, vector<32x32xf32>, vector<32x32xf32> -> vector<32x32xf32>
    %31 = arith.addf %27, %30 : vector<32x32xf32>
    %c1 = arith.constant 1 : index
    %c0_22 = arith.constant 0 : index
    %c0_23 = arith.constant 0 : index
    %32 = vector.load %arg4[%c1, %c0_22, %c0_23] : memref<3x128x32xf32, #tpu.memory_space<vmem>>, vector<1x128x32xf32>
    %33 = vector.shape_cast %32 : vector<1x128x32xf32> to vector<128x32xf32>
    %cst_24 = arith.constant dense<0.000000e+00> : vector<32x32xf32>
    %34 = tpu.matmul %6, %33, %cst_24 {dimension_numbers = #tpu.dot_dimension_numbers<[1], [0], [0], [1], [0, 0, 1, 1], [], []>} : vector<32x128xf32>, vector<128x32xf32>, vector<32x32xf32> -> vector<32x32xf32>
    %c1_25 = arith.constant 1 : index
    %c0_26 = arith.constant 0 : index
    %c0_27 = arith.constant 0 : index
    %35 = vector.load %arg5[%c1_25, %c0_26, %c0_27] : memref<3x32x32xf32, #tpu.memory_space<vmem>>, vector<1x32x32xf32>
    %36 = vector.shape_cast %35 : vector<1x32x32xf32> to vector<32x32xf32>
    %cst_28 = arith.constant dense<0.000000e+00> : vector<32x32xf32>
    %37 = tpu.matmul %13, %36, %cst_28 {dimension_numbers = #tpu.dot_dimension_numbers<[1], [0], [0], [1], [0, 0, 1, 1], [], []>} : vector<32x32xf32>, vector<32x32xf32>, vector<32x32xf32> -> vector<32x32xf32>
    %38 = arith.addf %34, %37 : vector<32x32xf32>
    %c1_29 = arith.constant 1 : index
    %c0_30 = arith.constant 0 : index
    %c0_31 = arith.constant 0 : index
    %39 = vector.load %arg6[%c1_29, %c0_30, %c0_31] : memref<3x32x32xf32, #tpu.memory_space<vmem>>, vector<1x32x32xf32>
    %40 = vector.shape_cast %39 : vector<1x32x32xf32> to vector<32x32xf32>
    %cst_32 = arith.constant dense<0.000000e+00> : vector<32x32xf32>
    %41 = tpu.matmul %20, %40, %cst_32 {dimension_numbers = #tpu.dot_dimension_numbers<[1], [0], [0], [1], [0, 0, 1, 1], [], []>} : vector<32x32xf32>, vector<32x32xf32>, vector<32x32xf32> -> vector<32x32xf32>
    %42 = arith.addf %38, %41 : vector<32x32xf32>
    %c2 = arith.constant 2 : index
    %c0_33 = arith.constant 0 : index
    %c0_34 = arith.constant 0 : index
    %43 = vector.load %arg4[%c2, %c0_33, %c0_34] : memref<3x128x32xf32, #tpu.memory_space<vmem>>, vector<1x128x32xf32>
    %44 = vector.shape_cast %43 : vector<1x128x32xf32> to vector<128x32xf32>
    %cst_35 = arith.constant dense<0.000000e+00> : vector<32x32xf32>
    %45 = tpu.matmul %6, %44, %cst_35 {dimension_numbers = #tpu.dot_dimension_numbers<[1], [0], [0], [1], [0, 0, 1, 1], [], []>} : vector<32x128xf32>, vector<128x32xf32>, vector<32x32xf32> -> vector<32x32xf32>
    %c2_36 = arith.constant 2 : index
    %c0_37 = arith.constant 0 : index
    %c0_38 = arith.constant 0 : index
    %46 = vector.load %arg5[%c2_36, %c0_37, %c0_38] : memref<3x32x32xf32, #tpu.memory_space<vmem>>, vector<1x32x32xf32>
    %47 = vector.shape_cast %46 : vector<1x32x32xf32> to vector<32x32xf32>
    %cst_39 = arith.constant dense<0.000000e+00> : vector<32x32xf32>
    %48 = tpu.matmul %13, %47, %cst_39 {dimension_numbers = #tpu.dot_dimension_numbers<[1], [0], [0], [1], [0, 0, 1, 1], [], []>} : vector<32x32xf32>, vector<32x32xf32>, vector<32x32xf32> -> vector<32x32xf32>
    %49 = arith.addf %45, %48 : vector<32x32xf32>
    %c2_40 = arith.constant 2 : index
    %c0_41 = arith.constant 0 : index
    %c0_42 = arith.constant 0 : index
    %50 = vector.load %arg6[%c2_40, %c0_41, %c0_42] : memref<3x32x32xf32, #tpu.memory_space<vmem>>, vector<1x32x32xf32>
    %51 = vector.shape_cast %50 : vector<1x32x32xf32> to vector<32x32xf32>
    %cst_43 = arith.constant dense<0.000000e+00> : vector<32x32xf32>
    %52 = tpu.matmul %20, %51, %cst_43 {dimension_numbers = #tpu.dot_dimension_numbers<[1], [0], [0], [1], [0, 0, 1, 1], [], []>} : vector<32x32xf32>, vector<32x32xf32>, vector<32x32xf32> -> vector<32x32xf32>
    %53 = arith.addf %49, %52 : vector<32x32xf32>
    %54 = tpu.iota {dimensions = array<i32: 1>} : vector<2x16x32xi32>
    %55 = vector.shape_cast %54 : vector<2x16x32xi32> to vector<32x32xi32>
    %c0_i32 = arith.constant 0 : i32
    %56 = vector.broadcast %c0_i32 : i32 to vector<32x32xi32>
    %57 = arith.cmpi eq, %55, %56 : vector<32x32xi32>
    %c1_i32 = arith.constant 1 : i32
    %58 = tpu.dynamic_rotate %31 by %c1_i32 dim 0 : vector<32x32xf32>, i32 -> vector<32x32xf32>
    %cst_44 = arith.constant 0.000000e+00 : f32
    %59 = vector.broadcast %cst_44 : f32 to vector<32x32xf32>
    %60 = arith.select %57, %59, %58 : vector<32x32xi1>, vector<32x32xf32>
    %c15_i32 = arith.constant 15 : i32
    %61 = vector.broadcast %c15_i32 : i32 to vector<32x32xi32>
    %62 = arith.cmpi eq, %55, %61 : vector<32x32xi32>
    %c31_i32 = arith.constant 31 : i32
    %63 = tpu.dynamic_rotate %53 by %c31_i32 dim 0 : vector<32x32xf32>, i32 -> vector<32x32xf32>
    %cst_45 = arith.constant 0.000000e+00 : f32
    %64 = vector.broadcast %cst_45 : f32 to vector<32x32xf32>
    %65 = arith.select %62, %64, %63 : vector<32x32xi1>, vector<32x32xf32>
    %66 = arith.addf %60, %42 : vector<32x32xf32>
    %67 = arith.addf %66, %65 : vector<32x32xf32>
    %c0_46 = arith.constant 0 : index
    %c0_47 = arith.constant 0 : index
    %68 = vector.load %arg7[%c0_46, %c0_47] : memref<1x32xf32, #tpu.memory_space<vmem>>, vector<1x32xf32>
    %69 = vector.broadcast %68 : vector<1x32xf32> to vector<32x32xf32>
    %70 = arith.addf %67, %69 : vector<32x32xf32>
    %c0_48 = arith.constant 0 : index
    %c0_49 = arith.constant 0 : index
    %71 = vector.load %arg3[%c0_48, %c0_49] : memref<32x1xi32, #tpu.memory_space<vmem>>, vector<32x1xi32>
    %c0_50 = arith.constant 0 : index
    %c0_51 = arith.constant 0 : index
    %72 = vector.load %arg9[%c0_50, %c0_51] : memref<1x128xf32, #tpu.memory_space<vmem>>, vector<1x128xf32>
    %c1_i32_52 = arith.constant 1 : i32
    %73 = vector.broadcast %c1_i32_52 : i32 to vector<32x1xi32>
    %74 = arith.cmpi eq, %71, %73 : vector<32x1xi32>
    %cst_53 = arith.constant 0.000000e+00 : f32
    %cst_54 = arith.constant 9.99999997E-7 : f32
    %75 = vector.broadcast %cst_53 : f32 to vector<32x1xf32>
    %76 = vector.broadcast %cst_54 : f32 to vector<32x1xf32>
    %77 = arith.select %74, %75, %76 : vector<32x1xi1>, vector<32x1xf32>
    %78 = vector.broadcast %77 : vector<32x1xf32> to vector<32x32xf32>
    %79 = arith.addf %70, %78 : vector<32x32xf32>
    %cst_55 = arith.constant 0.000000e+00 : f32
    %80 = vector.broadcast %cst_55 : f32 to vector<32x32xf32>
    %81 = arith.maximumf %79, %80 : vector<32x32xf32>
    %82 = vector.shape_cast %81 : vector<32x32xf32> to vector<2x16x32xf32>
    %cst_56 = arith.constant dense<0xFF800000> : vector<2x32xf32>
    %83 = vector.multi_reduction <maximumf>, %82, %cst_56 [1] : vector<2x16x32xf32> to vector<2x32xf32>
    %84 = math.tanh %83 : vector<2x32xf32>
    %c0_57 = arith.constant 0 : index
    %c0_58 = arith.constant 0 : index
    %c0_59 = arith.constant 0 : index
    %85 = vector.load %arg8[%c0_57, %c0_58, %c0_59] : memref<3x32x128xf32, #tpu.memory_space<vmem>>, vector<1x32x128xf32>
    %86 = vector.shape_cast %85 : vector<1x32x128xf32> to vector<32x128xf32>
    %cst_60 = arith.constant dense<0.000000e+00> : vector<2x128xf32>
    %87 = tpu.matmul %84, %86, %cst_60 {dimension_numbers = #tpu.dot_dimension_numbers<[1], [0], [0], [1], [0, 0, 1, 1], [], []>} : vector<2x32xf32>, vector<32x128xf32>, vector<2x128xf32> -> vector<2x128xf32>
    %88 = vector.broadcast %72 : vector<1x128xf32> to vector<2x128xf32>
    %89 = arith.addf %88, %87 : vector<2x128xf32>
    %c2_i32 = arith.constant 2 : i32
    %90 = vector.broadcast %c2_i32 : i32 to vector<32x1xi32>
    %91 = arith.cmpi eq, %71, %90 : vector<32x1xi32>
    %cst_61 = arith.constant 0.000000e+00 : f32
    %cst_62 = arith.constant 9.99999997E-7 : f32
    %92 = vector.broadcast %cst_61 : f32 to vector<32x1xf32>
    %93 = vector.broadcast %cst_62 : f32 to vector<32x1xf32>
    %94 = arith.select %91, %92, %93 : vector<32x1xi1>, vector<32x1xf32>
    %95 = vector.broadcast %94 : vector<32x1xf32> to vector<32x32xf32>
    %96 = arith.addf %70, %95 : vector<32x32xf32>
    %cst_63 = arith.constant 0.000000e+00 : f32
    %97 = vector.broadcast %cst_63 : f32 to vector<32x32xf32>
    %98 = arith.maximumf %96, %97 : vector<32x32xf32>
    %99 = vector.shape_cast %98 : vector<32x32xf32> to vector<2x16x32xf32>
    %cst_64 = arith.constant dense<0xFF800000> : vector<2x32xf32>
    %100 = vector.multi_reduction <maximumf>, %99, %cst_64 [1] : vector<2x16x32xf32> to vector<2x32xf32>
    %101 = math.tanh %100 : vector<2x32xf32>
    %c1_65 = arith.constant 1 : index
    %c0_66 = arith.constant 0 : index
    %c0_67 = arith.constant 0 : index
    %102 = vector.load %arg8[%c1_65, %c0_66, %c0_67] : memref<3x32x128xf32, #tpu.memory_space<vmem>>, vector<1x32x128xf32>
    %103 = vector.shape_cast %102 : vector<1x32x128xf32> to vector<32x128xf32>
    %cst_68 = arith.constant dense<0.000000e+00> : vector<2x128xf32>
    %104 = tpu.matmul %101, %103, %cst_68 {dimension_numbers = #tpu.dot_dimension_numbers<[1], [0], [0], [1], [0, 0, 1, 1], [], []>} : vector<2x32xf32>, vector<32x128xf32>, vector<2x128xf32> -> vector<2x128xf32>
    %105 = arith.addf %89, %104 : vector<2x128xf32>
    %c3_i32 = arith.constant 3 : i32
    %106 = vector.broadcast %c3_i32 : i32 to vector<32x1xi32>
    %107 = arith.cmpi eq, %71, %106 : vector<32x1xi32>
    %cst_69 = arith.constant 0.000000e+00 : f32
    %cst_70 = arith.constant 9.99999997E-7 : f32
    %108 = vector.broadcast %cst_69 : f32 to vector<32x1xf32>
    %109 = vector.broadcast %cst_70 : f32 to vector<32x1xf32>
    %110 = arith.select %107, %108, %109 : vector<32x1xi1>, vector<32x1xf32>
    %111 = vector.broadcast %110 : vector<32x1xf32> to vector<32x32xf32>
    %112 = arith.addf %70, %111 : vector<32x32xf32>
    %cst_71 = arith.constant 0.000000e+00 : f32
    %113 = vector.broadcast %cst_71 : f32 to vector<32x32xf32>
    %114 = arith.maximumf %112, %113 : vector<32x32xf32>
    %115 = vector.shape_cast %114 : vector<32x32xf32> to vector<2x16x32xf32>
    %cst_72 = arith.constant dense<0xFF800000> : vector<2x32xf32>
    %116 = vector.multi_reduction <maximumf>, %115, %cst_72 [1] : vector<2x16x32xf32> to vector<2x32xf32>
    %117 = math.tanh %116 : vector<2x32xf32>
    %c2_73 = arith.constant 2 : index
    %c0_74 = arith.constant 0 : index
    %c0_75 = arith.constant 0 : index
    %118 = vector.load %arg8[%c2_73, %c0_74, %c0_75] : memref<3x32x128xf32, #tpu.memory_space<vmem>>, vector<1x32x128xf32>
    %119 = vector.shape_cast %118 : vector<1x32x128xf32> to vector<32x128xf32>
    %cst_76 = arith.constant dense<0.000000e+00> : vector<2x128xf32>
    %120 = tpu.matmul %117, %119, %cst_76 {dimension_numbers = #tpu.dot_dimension_numbers<[1], [0], [0], [1], [0, 0, 1, 1], [], []>} : vector<2x32xf32>, vector<32x128xf32>, vector<2x128xf32> -> vector<2x128xf32>
    %121 = arith.addf %105, %120 : vector<2x128xf32>
    %c0_77 = arith.constant 0 : index
    %c0_78 = arith.constant 0 : index
    %122 = vector.load %arg10[%c0_77, %c0_78] : memref<2x128xf32, #tpu.memory_space<vmem>>, vector<2x128xf32>
    tpu.vector_store %arg10[%c0_77, %c0_78], %121 {strides = array<i32>} : memref<2x128xf32, #tpu.memory_space<vmem>>, vector<2x128xf32>,
    return
  }
}

</mosaic_0001>

<bundles_post_ra>
// kernel: pcnn_forward.1
= control target key start
LH: loop header
LB: loop body
LE: loop exit
PB: predicated region body
PF: predicated region fallthrough
CT: control target
= control target key end

     0   :  { %v940_v0 = vmov 0   ;;  %v941_v19 = vmov 1e-06   ;;  %v39_v51 = vlaneseq  ;;  %vm129_vm13 = vcmask 261120   ;;  %s1502_s1 = inlined_call_operand.vmem [shape: s32[32,1], index: 1, kind: input, shape index: {}]   ;;  %s1503_s0 = inlined_call_operand.vmem [shape: s32[32,1], index: 0, kind: input, shape index: {}]   ;;  %s1504_s2 = inlined_call_operand.vmem [shape: s32[32,1], index: 2, kind: input, shape index: {}]   ;;  %s1505_s3 = inlined_call_operand.vmem [shape: s32[32,1], index: 3, kind: input, shape index: {}]   ;;  %s1506_s4 = inlined_call_operand.vmem [shape: f32[3,128,32], index: 4, kind: input, shape index: {}]   ;;  %s1507_s5 = inlined_call_operand.vmem [shape: f32[3,32,32], index: 5, kind: input, shape index: {}]   ;;  %s1508_s6 = inlined_call_operand.vmem [shape: f32[3,32,32], index: 6, kind: input, shape index: {}]   ;;  %s1509_s7 = inlined_call_operand.vmem [shape: f32[1,32], index: 7, kind: input, shape index: {}]   ;;  %s1510_s9 = inlined_call_operand.vmem [shape: f32[1,128], index: 9, kind: input, shape index: {}]   ;;  %s1511_s8 = inlined_call_operand.vmem [shape: f32[3,32,128], index: 8, kind: input, shape index: {}]   ;;  %s1512_s10 = inlined_call_operand.vmem [shape: f32[2,128], index: 10, kind: output, shape index: {}]  }
   0x1   :  { %925 = vset.pattern.permute.xlu2 %v940_v0  ;;  %924 = vset.pattern.permute.xlu1 %v940_v0  ;;  %v63_v1 = vld [vmem:[%s1502_s1 + $0x10] sm:$0xff]  ;;  %v61_v2 = vld [vmem:[%s1502_s1] sm:$0xff]  ;;  %v62_v5 = vld [vmem:[%s1502_s1 + $0x8] sm:$0xff] }
   0x2   :  { %v35_v3 = vld [vmem:[%s1503_s0] sm:$0xff]  ;;  %923 = vset.pattern.permute.xlu0 %v940_v0  ;;  %72 = vperm.xlu1 %924, %v63_v1   ;;  %v64_v6 = vld [vmem:[%s1502_s1 + $0x18] sm:$0xff]  ;;  %v36_v7 = vld [vmem:[%s1503_s0 + $0x8] sm:$0xff]  ;;  %v1132_v59 = vand.u32 127, %v39_v51  ;;  %v942_v1 = vmov 1.0  }
   0x3   :  { %66 = vperm.xlu0 %923, %v61_v2   ;;  %42 = vperm.xlu2 %925, %v35_v3   ;;  %v85_v4 = vld [vmem:[%s1504_s2] sm:$0xff]  ;;  %v86_v8 = vld [vmem:[%s1504_s2 + $0x8] sm:$0xff]  ;;  %v87_v9 = vld [vmem:[%s1504_s2 + $0x10] sm:$0xff] }
   0x4   :  { %v38_v10 = vld [vmem:[%s1503_s0 + $0x18] sm:$0xff]  ;;  %v37_v11 = vld [vmem:[%s1503_s0 + $0x10] sm:$0xff]  ;;  %v535_v13 = vld [vmem:[%s1505_s3 + $0x8] sm:$0xff] }
   0x5   :  { %v88_v12 = vld [vmem:[%s1504_s2 + $0x18] sm:$0xff]  ;;  %v534_v14 = vld [vmem:[%s1505_s3] sm:$0xff]  ;;  %v536_v15 = vld [vmem:[%s1505_s3 + $0x10] sm:$0xff]  ;;  %vm540_vm0 = vcmp.eq.s32.totalorder %v535_v13, 1  ;;  %vm630_vm5 = vcmp.eq.s32.totalorder %v535_v13, 2  ;;  %vm717_vm10 = vcmp.eq.s32.totalorder %v535_v13, 3 }
   0x6   :  { %v124_v16 = vld [vmem:[%s1506_s4 + $0x78] sm:$0xff]  ;;  %v123_v17 = vld [vmem:[%s1506_s4 + $0x70] sm:$0xff]  ;;  %vm539_vm1 = vcmp.eq.s32.totalorder %v534_v14, 1  ;;  %vm541_vm2 = vcmp.eq.s32.totalorder %v536_v15, 1  ;;  %v122_v18 = vld [vmem:[%s1506_s4 + $0x68] sm:$0xff]  ;;  %v544_v20 = vsel %vm540_vm0, 0.0, %v941_v19 }
   0x7   :  { %171 = vmatpush.msra.mxu1 %v124_v16  ;;  %v543_v21 = vsel %vm539_vm1, 0.0, %v941_v19  ;;  %v545_v22 = vsel %vm541_vm2, 0.0, %v941_v19  ;;  %v537_v23 = vld [vmem:[%s1505_s3 + $0x18] sm:$0xff]  ;;  %vm629_vm3 = vcmp.eq.s32.totalorder %v534_v14, 2  ;;  %v634_v26 = vsel %vm630_vm5, 0.0, %v941_v19  ;;  %v121_v33 = vld [vmem:[%s1506_s4 + $0x60] sm:$0xff] }
   0x8   :  { %vm542_vm4 = vcmp.eq.s32.totalorder %v537_v23, 1  ;;  %v633_v24 = vsel %vm629_vm3, 0.0, %v941_v19  ;;  %vm632_vm6 = vcmp.eq.s32.totalorder %v537_v23, 2  ;;  %vm631_vm7 = vcmp.eq.s32.totalorder %v536_v15, 2  ;;  %v120_v34 = vld [vmem:[%s1506_s4 + $0x58] sm:$0xff]  ;;  %v119_v35 = vld [vmem:[%s1506_s4 + $0x50] sm:$0xff] }
   0x9   :  { %172 = vmatpush.msra.mxu1 %v123_v17  ;;  %v546_v25 = vsel %vm542_vm4, 0.0, %v941_v19  ;;  %vm716_vm8 = vcmp.eq.s32.totalorder %v534_v14, 3  ;;  %v636_v27 = vsel %vm632_vm6, 0.0, %v941_v19  ;;  %v635_v28 = vsel %vm631_vm7, 0.0, %v941_v19  ;;  %v118_v36 = vld [vmem:[%s1506_s4 + $0x48] sm:$0xff]  ;;  %v117_v37 = vld [vmem:[%s1506_s4 + $0x40] sm:$0xff] }
   0xa   :  { %90 = vperm.xlu1 %924, %v85_v4   ;;  %v720_v29 = vsel %vm716_vm8, 0.0, %v941_v19  ;;  %vm718_vm9 = vcmp.eq.s32.totalorder %v536_v15, 3  ;;  %vm719_vm11 = vcmp.eq.s32.totalorder %v537_v23, 3  ;;  %v721_v31 = vsel %vm717_vm10, 0.0, %v941_v19  ;;  %v116_v38 = vld [vmem:[%s1506_s4 + $0x38] sm:$0xff]  ;;  %v115_v39 = vld [vmem:[%s1506_s4 + $0x30] sm:$0xff] }
   0xb   :  { %69 = vperm.xlu0 %923, %v62_v5   ;;  %75 = vperm.xlu2 %925, %v64_v6   ;;  %v722_v30 = vsel %vm718_vm9, 0.0, %v941_v19  ;;  %v723_v32 = vsel %vm719_vm11, 0.0, %v941_v19  ;;  %v114_v40 = vld [vmem:[%s1506_s4 + $0x28] sm:$0xff]  ;;  %v113_v41 = vld [vmem:[%s1506_s4 + $0x20] sm:$0xff]  ;;  %v128_v42 = vld [vmem:[%s1507_s5 + $0x18] sm:$0xff] }
   0xc   :  { %173 = vmatpush.msra.mxu1 %v122_v18  ;;  %v112_v43 = vld [vmem:[%s1506_s4 + $0x18] sm:$0xff]  ;;  %154 = vmatpush.msra.mxu0 %v128_v42  ;;  %v127_v45 = vld [vmem:[%s1507_s5 + $0x10] sm:$0xff]  ;;  %v126_v48 = vld [vmem:[%s1507_s5 + $0x8] sm:$0xff] }
   0xd   :  { %v839_v44 = vld [vmem:[%s1507_s5 + $0x38] sm:$0xff]  ;;  %v111_v46 = vld [vmem:[%s1506_s4 + $0x10] sm:$0xff]  ;;  %v837_v49 = vld [vmem:[%s1507_s5 + $0x28] sm:$0xff] }
   0xe   :  { %174 = vmatpush.msra.mxu1 %v121_v33  ;;  %283 = vmatpush.msra.mxu3 %v839_v44  ;;  %v838_v47 = vld [vmem:[%s1507_s5 + $0x30] sm:$0xff]  ;;  %v110_v50 = vld [vmem:[%s1506_s4 + $0x8] sm:$0xff]  ;;  %v125_v52 = vld [vmem:[%s1507_s5] sm:$0xff] }
   0xf   :  { %155 = vmatpush.msra.mxu0 %v127_v45  ;;  %v109_v53 = vld [vmem:[%s1506_s4] sm:$0xff]  ;;  %v835_v55 = vld [vmem:[%s1506_s4 + $0xf8] sm:$0xff]  ;;  %v834_v57 = vld [vmem:[%s1506_s4 + $0xf0] sm:$0xff] }
  0x10   :  { %175 = vmatpush.msra.mxu1 %v120_v34  ;;  %284 = vmatpush.msra.mxu3 %v838_v47  ;;  %v836_v54 = vld [vmem:[%s1507_s5 + $0x20] sm:$0xff]  ;;  %v203_v56 = vld [vmem:[%s1508_s6 + $0x18] sm:$0xff]  ;;  %v202_v58 = vld [vmem:[%s1508_s6 + $0x10] sm:$0xff] }
  0x11   :  { %156 = vmatpush.msra.mxu0 %v126_v48  ;;  %228 = vmatpush.msra.mxu2 %v203_v56  ;;  %v833_v60 = vld [vmem:[%s1506_s4 + $0xe8] sm:$0xff]  ;;  %v832_v63 = vld [vmem:[%s1506_s4 + $0xe0] sm:$0xff]  ;;  %v871_v2 = vld [vmem:[%s1506_s4 + $0x178] sm:$0xff] }
  0x12   :  { %45 = vperm.xlu1 %924, %v36_v7   ;;  %176 = vmatpush.msra.mxu1 %v119_v35  ;;  %v201_v61 = vld [vmem:[%s1508_s6 + $0x8] sm:$0xff]  ;;  %v200_v0 = vld [vmem:[%s1508_s6] sm:$0xff]  ;;  %v831_v3 = vld [vmem:[%s1506_s4 + $0xd8] sm:$0xff] }
  0x13   :  { %93 = vperm.xlu0 %923, %v86_v8   ;;  %96 = vperm.xlu2 %925, %v87_v9   ;;  %v830_v4 = vld [vmem:[%s1506_s4 + $0xd0] sm:$0xff]  ;;  %v829_v6 = vld [vmem:[%s1506_s4 + $0xc8] sm:$0xff]  ;;  %v868_v8 = vld [vmem:[%s1506_s4 + $0x160] sm:$0xff] }
  0x14   :  { %177 = vmatpush.msra.mxu1 %v118_v36  ;;  %285 = vmatpush.msra.mxu3 %v837_v49  ;;  %v870_v5 = vld [vmem:[%s1506_s4 + $0x170] sm:$0xff]  ;;  %v869_v7 = vld [vmem:[%s1506_s4 + $0x168] sm:$0xff]  ;;  %v828_v9 = vld [vmem:[%s1506_s4 + $0xc0] sm:$0xff] }
  0x15   :  { %157 = vmatpush.msra.mxu0 %v125_v52  ;;  %229 = vmatpush.msra.mxu2 %v202_v58  ;;  %v866_v13 = vld [vmem:[%s1506_s4 + $0x150] sm:$0xff]  ;;  %v851_v14 = vld [vmem:[%s1508_s6 + $0x38] sm:$0xff]  ;;  %v865_v15 = vld [vmem:[%s1506_s4 + $0x148] sm:$0xff] }
  0x16   :  { %178 = vmatpush.msra.mxu1 %v117_v37  ;;  %286 = vmatpush.msra.mxu3 %v836_v54  ;;  %v825_v16 = vld [vmem:[%s1506_s4 + $0xa8] sm:$0xff]  ;;  %v824_v17 = vld [vmem:[%s1506_s4 + $0xa0] sm:$0xff]  ;;  %v863_v19 = vld [vmem:[%s1506_s4 + $0x138] sm:$0xff] }
  0x17   :  { %300 = vmatpush.msrb.mxu0 %v835_v55  ;;  %230 = vmatpush.msra.mxu2 %v201_v61  ;;  %v864_v18 = vld [vmem:[%s1506_s4 + $0x140] sm:$0xff]  ;;  %v850_v23 = vld [vmem:[%s1508_s6 + $0x30] sm:$0xff]  ;;  %v887_v33 = vld [vmem:[%s1508_s6 + $0x58] sm:$0xff] }
  0x18   :  { %179 = vmatpush.msra.mxu1 %v116_v38  ;;  %903 = vmatpush.msrb.mxu3 %v835_v55  ;;  %v875_v34 = vld [vmem:[%s1507_s5 + $0x58] sm:$0xff]  ;;  %v858_v35 = vld [vmem:[%s1506_s4 + $0x110] sm:$0xff]  ;;  %v849_v37 = vld [vmem:[%s1508_s6 + $0x28] sm:$0xff] }
  0x19   :  { %301 = vmatpush.msrb.mxu0 %v834_v57  ;;  %231 = vmatpush.msra.mxu2 %v200_v0  ;;  %v874_v36 = vld [vmem:[%s1507_s5 + $0x50] sm:$0xff]  ;;  %v857_v38 = vld [vmem:[%s1506_s4 + $0x108] sm:$0xff]  ;;  %v856_v44 = vld [vmem:[%s1506_s4 + $0x100] sm:$0xff] }
  0x1a   :  { %51 = vperm.xlu1 %924, %v38_v10   ;;  %180 = vmatpush.msra.mxu1 %v115_v39  ;;  %v867_v10 = vld [vmem:[%s1506_s4 + $0x158] sm:$0xff]  ;;  %v886_v42 = vld [vmem:[%s1508_s6 + $0x50] sm:$0xff]  ;;  %v848_v45 = vld [vmem:[%s1508_s6 + $0x20] sm:$0xff] }
  0x1b   :  { %48 = vperm.xlu0 %923, %v37_v11   ;;  %99 = vperm.xlu2 %925, %v88_v12   ;;  %v827_v11 = vld [vmem:[%s1506_s4 + $0xb8] sm:$0xff]  ;;  %v826_v12 = vld [vmem:[%s1506_s4 + $0xb0] sm:$0xff]  ;;  %v872_v48 = vld [vmem:[%s1507_s5 + $0x40] sm:$0xff] }
  0x1c   :  { %181 = vmatpush.msra.mxu1 %v114_v40  ;;  %904 = vmatpush.msrb.mxu3 %v834_v57  ;;  %v873_v40 = vld [vmem:[%s1507_s5 + $0x48] sm:$0xff]  ;;  %v884_v56 = vld [vmem:[%s1508_s6 + $0x40] sm:$0xff] }
  0x1d   :  { %302 = vmatpush.msrb.mxu0 %v833_v60  ;;  %346 = vmatpush.msrb.mxu2 %v851_v14  ;;  %v885_v49 = vld [vmem:[%s1508_s6 + $0x48] sm:$0xff] }
  0x1e   :  { %182 = vmatpush.msra.mxu1 %v113_v41  ;;  %905 = vmatpush.msrb.mxu3 %v833_v60 }
  0x1f   :  { %303 = vmatpush.msrb.mxu0 %v832_v63  ;;  %347 = vmatpush.msrb.mxu2 %v850_v23 }
  0x20   :  { %183 = vmatpush.msra.mxu1 %v112_v43  ;;  %906 = vmatpush.msrb.mxu3 %v832_v63 }
  0x21   :  { %304 = vmatpush.msrb.mxu0 %v831_v3  ;;  %348 = vmatpush.msrb.mxu2 %v849_v37 }
  0x22   :  { %554 = vperm.xlu1 %924, %v544_v20   ;;  %184 = vmatpush.msra.mxu1 %v111_v46  ;;  %v823_v20 = vld [vmem:[%s1506_s4 + $0x98] sm:$0xff] }
  0x23   :  { %549 = vperm.xlu0 %923, %v543_v21   ;;  %559 = vperm.xlu2 %925, %v545_v22   ;;  %v822_v21 = vld [vmem:[%s1506_s4 + $0x90] sm:$0xff] }
  0x24   :  { %185 = vmatpush.msra.mxu1 %v110_v50  ;;  %907 = vmatpush.msrb.mxu3 %v831_v3  ;;  %v862_v22 = vld [vmem:[%s1506_s4 + $0x130] sm:$0xff] }
  0x25   :  { %305 = vmatpush.msrb.mxu0 %v830_v4  ;;  %349 = vmatpush.msrb.mxu2 %v848_v45 }
  0x26   :  { %186 = vmatpush.msra.mxu1 %v109_v53  ;;  %908 = vmatpush.msrb.mxu3 %v830_v4 }
  0x27   :  { %306 = vmatpush.msrb.mxu0 %v829_v6 }
  0x28   :  { %418 = vmatpush.msrb.mxu1 %v871_v2  ;;  %909 = vmatpush.msrb.mxu3 %v829_v6 }
  0x29   :  { %307 = vmatpush.msrb.mxu0 %v828_v9 }
  0x2a   :  { %639 = vperm.xlu1 %924, %v633_v24   ;;  %419 = vmatpush.msrb.mxu1 %v870_v5  ;;  %v861_v24 = vld [vmem:[%s1506_s4 + $0x128] sm:$0xff] }
  0x2b   :  { %564 = vperm.xlu0 %923, %v546_v25   ;;  %644 = vperm.xlu2 %925, %v634_v26   ;;  %v821_v25 = vld [vmem:[%s1506_s4 + $0x88] sm:$0xff] }
  0x2c   :  { %420 = vmatpush.msrb.mxu1 %v869_v7  ;;  %910 = vmatpush.msrb.mxu3 %v828_v9 }
  0x2d   :  { %308 = vmatpush.msrb.mxu0 %v827_v11 }
  0x2e   :  { %421 = vmatpush.msrb.mxu1 %v868_v8  ;;  %911 = vmatpush.msrb.mxu3 %v827_v11 }
  0x2f   :  { %309 = vmatpush.msrb.mxu0 %v826_v12 }
  0x30   :  { %422 = vmatpush.msrb.mxu1 %v867_v10  ;;  %912 = vmatpush.msrb.mxu3 %v826_v12 }
  0x31   :  { %310 = vmatpush.msrb.mxu0 %v825_v16 }
  0x32   :  { %654 = vperm.xlu1 %924, %v636_v27   ;;  %423 = vmatpush.msrb.mxu1 %v866_v13 }
  0x33   :  { %649 = vperm.xlu0 %923, %v635_v28   ;;  %726 = vperm.xlu2 %925, %v720_v29   ;;  %v860_v28 = vld [vmem:[%s1506_s4 + $0x120] sm:$0xff] }
  0x34   :  { %424 = vmatpush.msrb.mxu1 %v865_v15  ;;  %913 = vmatpush.msrb.mxu3 %v825_v16  ;;  %v820_v29 = vld [vmem:[%s1506_s4 + $0x80] sm:$0xff] }
  0x35   :  { %311 = vmatpush.msrb.mxu0 %v824_v17 }
  0x36   :  { %425 = vmatpush.msrb.mxu1 %v864_v18  ;;  %914 = vmatpush.msrb.mxu3 %v824_v17 }
  0x37   :  { %312 = vmatpush.msrb.mxu0 %v823_v20 }
  0x38   :  { %426 = vmatpush.msrb.mxu1 %v863_v19  ;;  %915 = vmatpush.msrb.mxu3 %v823_v20 }
  0x39   :  { %313 = vmatpush.msrb.mxu0 %v822_v21 }
  0x3a   :  { %736 = vperm.xlu1 %924, %v722_v30   ;;  %427 = vmatpush.msrb.mxu1 %v862_v22  ;;  %v943_v30 = vmov 0.0  }
  0x3b   :  { %731 = vperm.xlu0 %923, %v721_v31   ;;  %741 = vperm.xlu2 %925, %v723_v32   ;;  %v859_v32 = vld [vmem:[%s1506_s4 + $0x118] sm:$0xff] }
  0x3c   :  { %916 = vmatpush.msrb.mxu3 %v822_v21  ;;  %428 = vmatpush.msrb.mxu1 %v861_v24 }
  0x3d   :  { %314 = vmatpush.msrb.mxu0 %v821_v25 }
  0x3e   :  { %917 = vmatpush.msrb.mxu3 %v821_v25  ;;  %429 = vmatpush.msrb.mxu1 %v860_v28 }
  0x3f   :  { %315 = vmatpush.msrb.mxu0 %v820_v29 }
  0x40   :  { %918 = vmatpush.msrb.mxu3 %v820_v29  ;;  %430 = vmatpush.msrb.mxu1 %v859_v32 }
  0x42   :  { %431 = vmatpush.msrb.mxu1 %v858_v35 }
  0x44   :  { %432 = vmatpush.msrb.mxu1 %v857_v38 }
  0x46   :  { %433 = vmatpush.msrb.mxu1 %v856_v44 }
  0x5d   :  { %v1140_v62 = vpop.permute.xlu2 %42 }
  0x5e   :  { %vm53_vm12 = vcmp.eq.s32.totalorder %v1140_v62, %v1132_v59 }
  0x5f   :  { %812 = vmatmul.msk.f32.vlgmr.msra.gmra.mxu1 %vm53_vm12, %v942_v1 }
  0x65   :  { %v76_v46 = vpop.permute.xlu2 %75 }
  0x66   :  { %vm80_vm4 = vcmp.eq.s32.totalorder %v76_v46, %v1132_v59 }
  0x67   :  { %v84_v58 = vsel %vm80_vm4, 1.0, %v943_v30 }
  0x6d   :  { %v97_v55 = vpop.permute.xlu2 %96 }
  0x6e   :  { %vm103_vm5 = vcmp.eq.s32.totalorder %v97_v55, %v1132_v59 }
  0x6f   :  { %v107_v60 = vsel %vm103_vm5, 1.0, %v943_v30 }
  0x74   :  { %v73_v26 = vpop.permute.xlu1 %72 }
  0x75   :  { %v67_v27 = vpop.permute.xlu0 %66  ;;  %vm79_vm1 = vcmp.eq.s32.totalorder %v73_v26, %v1132_v59  ;;  %v100_v61 = vpop.permute.xlu2 %99 }
  0x76   :  { %vm77_vm14 = vcmp.eq.s32.totalorder %v67_v27, %v1132_v59  ;;  %v83_v53 = vsel %vm79_vm1, 1.0, %v943_v30  ;;  %vm104_vm7 = vcmp.eq.s32.totalorder %v100_v61, %v1132_v59 }
  0x77   :  { %v1234_v31 = vsel %vm77_vm14, 1.0, %v943_v30  ;;  %v108_v0 = vsel %vm104_vm7, 1.0, %v943_v30  ;;  %vm601_vm14 = vcmask 1041409  }
  0x78   :  { %808 = vmatmul.msk.f32.vlgmr.msra.gmra.mxu0 %vm129_vm13, %v1234_v31  ;;  %840 = vmatmul.msk.f32.vlgmr.msra.gmra.mxu3 %vm129_vm13, %v1234_v31 }
  0x79   :  { %464 = vmatpush.msra.mxu0 %v887_v33  ;;  %401 = vmatpush.msra.mxu3 %v875_v34 }
  0x7b   :  { %402 = vmatpush.msra.mxu3 %v874_v36  ;;  %465 = vmatpush.msra.mxu0 %v886_v42 }
  0x7c   :  { %v91_v39 = vpop.permute.xlu1 %90 }
  0x7d   :  { %vm101_vm15 = vcmp.eq.s32.totalorder %v91_v39, %v1132_v59  ;;  %v70_v41 = vpop.permute.xlu0 %69  ;;  %403 = vmatpush.msra.mxu3 %v873_v40  ;;  %466 = vmatpush.msra.mxu0 %v885_v49  ;;  %v1382_v40 = vpop.permute.xlu2 %559 }
  0x7e   :  { %v105_v43 = vsel %vm101_vm15, 1.0, %v943_v30  ;;  %vm78_vm0 = vcmp.eq.s32.totalorder %v70_v41, %v1132_v59 }
  0x7f   :  { %v82_v47 = vsel %vm78_vm0, 1.0, %v943_v30  ;;  %816 = vmatmul.msk.f32.vlgmr.msra.gmra.mxu2 %vm129_vm13, %v105_v43  ;;  %404 = vmatpush.msra.mxu3 %v872_v48 }
  0x80   :  { %809 = vmatmul.msk.f32.gmra.mxu0 %vm129_vm13, %v82_v47  ;;  %841 = vmatmul.msk.f32.gmra.mxu3 %vm129_vm13, %v82_v47 }
  0x81   :  { %467 = vmatpush.msra.mxu0 %v884_v56 }
  0x84   :  { %v46_v50 = vpop.permute.xlu1 %45 }
  0x85   :  { %v94_v52 = vpop.permute.xlu0 %93  ;;  %vm54_vm2 = vcmp.eq.s32.totalorder %v46_v50, %v1132_v59 }
  0x86   :  { %vm102_vm3 = vcmp.eq.s32.totalorder %v94_v52, %v1132_v59  ;;  %813 = vmatmul.msk.f32.gmra.mxu1 %vm54_vm2, %v942_v1  ;;  %v1391_v52 = vpop.permute.xlu2 %644 }
  0x87   :  { %v106_v54 = vsel %vm102_vm3, 1.0, %v943_v30 }
  0x88   :  { %810 = vmatmul.msk.f32.gmra.mxu0 %vm129_vm13, %v83_v53  ;;  %817 = vmatmul.msk.f32.gmra.mxu2 %vm129_vm13, %v106_v54 }
  0x89   :  { %842 = vmatmul.msk.f32.gmra.mxu3 %vm129_vm13, %v83_v53 }
  0x8c   :  { %v52_v63 = vpop.permute.xlu1 %51 }
  0x8d   :  { %v49_v57 = vpop.permute.xlu0 %48  ;;  %vm56_vm8 = vcmp.eq.s32.totalorder %v52_v63, %v1132_v59 }
  0x8e   :  { %vm55_vm6 = vcmp.eq.s32.totalorder %v49_v57, %v1132_v59  ;;  %v1397_v57 = vld [vmem:[%s1509_s7] ss:$0 sm:$0xff] }
  0x8f   :  { %814 = vmatmul.msk.f32.gmra.mxu1 %vm55_vm6, %v942_v1 }
  0x90   :  { %811 = vmatmul.msk.f32.gmra.mxu0 %vm129_vm13, %v84_v58  ;;  %818 = vmatmul.msk.f32.gmra.mxu2 %vm129_vm13, %v107_v60 }
  0x91   :  { %843 = vmatmul.msk.f32.gmra.mxu3 %vm129_vm13, %v84_v58 }
  0x95   :  { %v550_v37 = vpop.permute.xlu0 %549 }
  0x97   :  { %815 = vmatmul.msk.f32.gmra.mxu1 %vm56_vm8, %v942_v1 }
  0x98   :  { %819 = vmatmul.msk.f32.gmra.mxu2 %vm129_vm13, %v108_v0  ;;  %844 = vmatmul.msk.f32.vlgmr.msrb.gmra.mxu0 %vm53_vm12, %v942_v1 }
  0x99   :  { %847 = vmatmul.msk.f32.vlgmr.msrb.gmra.mxu3 %vm56_vm8, %v942_v1 }
  0x9d   :  { %v1386_v45 = vpop.permute.xlu0 %564 }
  0x9f   :  { %880 = vmatmul.msk.f32.vlgmr.msrb.gmra.mxu1 %vm53_vm12, %v942_v1 }
  0xa0   :  { %845 = vmatmul.msk.f32.gmra.mxu0 %vm54_vm2, %v942_v1  ;;  %852 = vmatmul.msk.f32.vlgmr.msrb.gmra.mxu2 %vm129_vm13, %v105_v43 }
  0xa1   :  { %876 = vmatmul.msk.f32.vlgmr.msra.gmra.mxu3 %vm129_vm13, %v1234_v31 }
  0xa7   :  { %881 = vmatmul.msk.f32.gmra.mxu1 %vm54_vm2, %v942_v1 }
  0xa8   :  { %846 = vmatmul.msk.f32.gmra.mxu0 %vm55_vm6, %v942_v1  ;;  %853 = vmatmul.msk.f32.gmra.mxu2 %vm129_vm13, %v106_v54 }
  0xa9   :  { %877 = vmatmul.msk.f32.gmra.mxu3 %vm129_vm13, %v82_v47 }
  0xaf   :  { %882 = vmatmul.msk.f32.gmra.mxu1 %vm55_vm6, %v942_v1 }
  0xb0   :  { %854 = vmatmul.msk.f32.gmra.mxu2 %vm129_vm13, %v107_v60  ;;  %888 = vmatmul.msk.f32.vlgmr.msra.gmra.mxu0 %vm129_vm13, %v105_v43  ;;  %v1384_v43 = vpop.permute.xlu1 %554 }
  0xb1   :  { %878 = vmatmul.msk.f32.gmra.mxu3 %vm129_vm13, %v83_v53 }
  0xb7   :  { %883 = vmatmul.msk.f32.gmra.mxu1 %vm56_vm8, %v942_v1  ;;  %v1358_v1 = vshrl.u32 %v39_v51, 7 }
  0xb8   :  { %855 = vmatmul.msk.f32.gmra.mxu2 %vm129_vm13, %v108_v0  ;;  %889 = vmatmul.msk.f32.gmra.mxu0 %vm129_vm13, %v106_v54  ;;  %v640_v61 = vpop.permute.xlu1 %639 }
  0xb9   :  { %879 = vmatmul.msk.f32.gmra.mxu3 %vm129_vm13, %v84_v58  ;;  %vm494_vm9 = vcmp.lt.s32.totalorder %v1358_v1, 1  ;;  %vm488_vm10 = vcmp.eq.s32.totalorder %v1358_v1, 0  ;;  %vm509_vm11 = vcmp.lt.s32.totalorder %v1358_v1, 7 }
  0xc0   :  { %890 = vmatmul.msk.f32.gmra.mxu0 %vm129_vm13, %v107_v60 }
  0xc8   :  { %891 = vmatmul.msk.f32.gmra.mxu0 %vm129_vm13, %v108_v0 }
  0xdc   :  { %v188_v2 = vpop.f32.mrf.mxu1 }
  0xf5   :  { %v159_v62 = vpop.f32.mrf.mxu0 }
  0xf6   :  { %v189_v59 = vadd.f32 %v188_v2, %v159_v62 }
  0xfb   :  { %v288_v3 = vpop.f32.mrf.mxu3 }
  0xfd   :  { %v162_v4 = vpop.f32.mrf.mxu0 }
 0x102   :  { %v233_v5 = vpop.f32.mrf.mxu2 }
 0x103   :  { %v291_v6 = vpop.f32.mrf.mxu3  ;;  %v191_v7 = vpop.f32.mrf.mxu1  ;;  %v245_v9 = vadd.f32 %v233_v5, %v189_v59 }
 0x104   :  { %v192_v10 = vadd.f32 %v191_v7, %v162_v4  ;;  %v1406_v4 = vpop.permute.xlu0 %649 }
 0x105   :  { %v165_v8 = vpop.f32.mrf.mxu0  ;;  %v490_v16 = vrot.slane %v245_v9, 7 }
 0x10b   :  { %v236_v11 = vpop.f32.mrf.mxu2 }
 0x10c   :  { %v1360_v12 = vadd.f32 %v236_v11, %v192_v10  ;;  %v1362_v13 = vpop.f32.mrf.mxu3  ;;  %v194_v14 = vpop.f32.mrf.mxu1 }
 0x10d   :  { %v168_v15 = vpop.f32.mrf.mxu0  ;;  %v195_v58 = vadd.f32 %v194_v14, %v165_v8 }
 0x10e   :  { %v491_v17 = vrot.slane %v1360_v12, 7 }
 0x110   :  { %v1370_v51 = vsel %vm494_vm9, %v490_v16, %v491_v17 }
 0x113   :  { %v239_v18 = vpop.f32.mrf.mxu2 }
 0x114   :  { %v297_v19 = vpop.f32.mrf.mxu3  ;;  %v197_v21 = vpop.f32.mrf.mxu1  ;;  %v247_v0 = vadd.f32 %v239_v18, %v195_v58 }
 0x115   :  { %v317_v20 = vpop.f32.mrf.mxu0  ;;  %v198_v22 = vadd.f32 %v197_v21, %v168_v15  ;;  %v727_v15 = vpop.permute.xlu2 %726 }
 0x116   :  { %v318_v28 = vadd.f32 %v317_v20, %v288_v3  ;;  %v1404_v3 = vadd.s32 8, %v1358_v1  ;;  %v492_v9 = vrot.slane %v247_v0, 7  ;;  %v900_v1 = vld [vmem:[%s1511_s8 + $0x50] sm:$0xff] }
 0x118   :  { %vm504_vm12 = vcmp.eq.s32.totalorder %v1404_v3, 15 }
 0x11b   :  { %v242_v23 = vpop.f32.mrf.mxu2 }
 0x11c   :  { %v1372_v24 = vadd.f32 %v242_v23, %v198_v22  ;;  %v326_v25 = vpop.f32.mrf.mxu3  ;;  %v435_v33 = vpop.f32.mrf.mxu1 }
 0x11d   :  { %v320_v26 = vpop.f32.mrf.mxu0 }
 0x11e   :  { %v493_v27 = vrot.slane %v1372_v24, 7  ;;  %v321_v62 = vadd.f32 %v320_v26, %v291_v6 }
 0x120   :  { %v498_v29 = vsel %vm494_vm9, %v493_v27, %v490_v16  ;;  %v327_v16 = vadd.f32 %v326_v25, %v297_v19  ;;  %v496_v19 = vsel %vm494_vm9, %v491_v17, %v492_v9  ;;  %v596_v17 = vld [vmem:[%s1511_s8 + $0x8] sm:$0xff] }
 0x121   :  { %v499_v34 = vsel %vm488_vm10, 0.0, %v498_v29  ;;  %v598_v29 = vld [vmem:[%s1511_s8 + $0x18] sm:$0xff] }
 0x122   :  { %617 = vmatpush.msra.mxu2 %v598_v29 }
 0x123   :  { %v351_v30 = vpop.f32.mrf.mxu2 }
 0x124   :  { %v363_v31 = vadd.f32 %v351_v30, %v318_v28  ;;  %v406_v32 = vpop.f32.mrf.mxu3  ;;  %v438_v42 = vpop.f32.mrf.mxu1  ;;  %v597_v30 = vld [vmem:[%s1511_s8 + $0x10] sm:$0xff] }
 0x125   :  { %v323_v35 = vpop.f32.mrf.mxu0  ;;  %v436_v44 = vadd.f32 %v435_v33, %v406_v32  ;;  %v1432_v32 = vpop.permute.xlu1 %654  ;;  %618 = vmatpush.msra.mxu2 %v597_v30 }
 0x126   :  { %v518_v36 = vadd.f32 %v499_v34, %v363_v31  ;;  %v324_v21 = vadd.f32 %v323_v35, %v1362_v13  ;;  %v895_v31 = vld [vmem:[%s1511_s8 + $0x30] sm:$0xff] }
 0x127   :  { %619 = vmatpush.msra.mxu2 %v596_v17 }
 0x12b   :  { %v354_v41 = vpop.f32.mrf.mxu2 }
 0x12c   :  { %v409_v38 = vpop.f32.mrf.mxu3  ;;  %v441_v56 = vpop.f32.mrf.mxu1  ;;  %v364_v59 = vadd.f32 %v354_v41, %v321_v62  ;;  %v501_v41 = vsel %vm488_vm10, 0.0, %v496_v19 }
 0x12d   :  { %v469_v39 = vpop.f32.mrf.mxu0  ;;  %v439_v46 = vadd.f32 %v438_v42, %v409_v38 }
 0x12e   :  { %v1388_v47 = vadd.f32 %v469_v39, %v436_v44  ;;  %v519_v6 = vadd.f32 %v1370_v51, %v364_v59  ;;  %v896_v51 = vld [vmem:[%s1511_s8 + $0x38] sm:$0xff]  ;;  %v732_v39 = vpop.permute.xlu0 %731 }
 0x12f   :  { %707 = vmatpush.msrb.mxu3 %v896_v51 }
 0x130   :  { %v505_v53 = vrot.slane %v1388_v47, 1  ;;  %v901_v47 = vld [vmem:[%s1511_s8 + $0x58] sm:$0xff] }
 0x131   :  { %708 = vmatpush.msrb.mxu3 %v895_v31 }
 0x133   :  { %v357_v54 = vpop.f32.mrf.mxu2 }
 0x134   :  { %v412_v50 = vpop.f32.mrf.mxu3  ;;  %v444_v22 = vpop.f32.mrf.mxu1  ;;  %v365_v33 = vadd.f32 %v357_v54, %v324_v21 }
 0x135   :  { %v472_v48 = vpop.f32.mrf.mxu0  ;;  %v442_v2 = vadd.f32 %v441_v56, %v412_v50 }
 0x136   :  { %v482_v49 = vadd.f32 %v472_v48, %v439_v46  ;;  %v495_v46 = vsel %vm494_vm9, %v492_v9, %v493_v27  ;;  %v595_v48 = vld [vmem:[%s1511_s8] sm:$0xff]  ;;  %v520_v24 = vadd.f32 %v501_v41, %v365_v33 }
 0x137   :  { %620 = vmatpush.msra.mxu2 %v595_v48 }
 0x138   :  { %v506_v55 = vrot.slane %v482_v49, 1  ;;  %v893_v49 = vld [vmem:[%s1511_s8 + $0x20] sm:$0xff] }
 0x139   :  { %794 = vmatpush.msrb.mxu2 %v901_v47 }
 0x13a   :  { %v512_v60 = vsel %vm509_vm11, %v505_v53, %v506_v55 }
 0x13b   :  { %v522_v63 = vadd.f32 %v518_v36, %v512_v60  ;;  %v360_v18 = vpop.f32.mrf.mxu2  ;;  %v894_v36 = vld [vmem:[%s1511_s8 + $0x28] sm:$0xff]  ;;  %795 = vmatpush.msrb.mxu2 %v900_v1 }
 0x13c   :  { %v415_v14 = vpop.f32.mrf.mxu3  ;;  %v366_v12 = vadd.f32 %v360_v18, %v327_v16  ;;  %709 = vmatpush.msrb.mxu3 %v894_v36 }
 0x13d   :  { %v530_v5 = vadd.f32 %v1397_v57, %v522_v63  ;;  %v475_v7 = vpop.f32.mrf.mxu0  ;;  %v445_v13 = vadd.f32 %v444_v22, %v415_v14 }
 0x13e   :  { %v483_v8 = vadd.f32 %v475_v7, %v442_v2  ;;  %v521_v27 = vadd.f32 %v495_v46, %v366_v12  ;;  %710 = vmatpush.msrb.mxu3 %v893_v49 }
 0x13f   :  { %v567_v11 = vadd.f32 %v550_v37, %v530_v5  ;;  %v657_v23 = vadd.f32 %v640_v61, %v530_v5  ;;  %v744_v26 = vadd.f32 %v727_v15, %v530_v5  ;;  %v737_v15 = vpop.permute.xlu1 %736 }
 0x140   :  { %v507_v10 = vrot.slane %v483_v8, 1 }
 0x141   :  { %v571_v34 = vmax.f32 %v567_v11, 0.0  ;;  %v661_v42 = vmax.f32 %v657_v23, 0.0  ;;  %v748_v44 = vmax.f32 %v744_v26, 0.0  ;;  %v742_v26 = vpop.permute.xlu2 %741 }
 0x142   :  { %v511_v20 = vsel %vm509_vm11, %v506_v55, %v507_v10 }
 0x143   :  { %v515_v28 = vsel %vm504_vm12, 0.0, %v511_v20  ;;  %v575_v58 = vsel %vm129_vm13, %v571_v34, -inf  ;;  %v899_v20 = vld [vmem:[%s1511_s8 + $0x48] sm:$0xff] }
 0x144   :  { %v523_v25 = vadd.f32 %v519_v6, %v515_v28  ;;  %796 = vmatpush.msrb.mxu2 %v899_v20 }
 0x145   :  { %v478_v35 = vpop.f32.mrf.mxu0 }
 0x146   :  { %v531_v37 = vadd.f32 %v1397_v57, %v523_v25  ;;  %v484_v38 = vadd.f32 %v478_v35, %v445_v13 }
 0x148   :  { %v568_v50 = vadd.f32 %v1384_v43, %v531_v37  ;;  %v658_v54 = vadd.f32 %v1391_v52, %v531_v37  ;;  %v745_v55 = vadd.f32 %v732_v39, %v531_v37  ;;  %v508_v56 = vrot.slane %v484_v38, 1 }
 0x149   :  { %v665_v43 = vsel %vm129_vm13, %v661_v42, -inf  ;;  %v752_v52 = vsel %vm129_vm13, %v748_v44, -inf }
 0x14a   :  { %v572_v60 = vmax.f32 %v568_v50, 0.0  ;;  %v662_v61 = vmax.f32 %v658_v54, 0.0  ;;  %v749_v63 = vmax.f32 %v745_v55, 0.0  ;;  %v510_v0 = vsel %vm509_vm11, %v507_v10, %v508_v56 }
 0x14b   :  { %v513_v62 = vsel %vm509_vm11, %v508_v56, %v505_v53  ;;  %v524_v2 = vadd.f32 %v520_v24, %v510_v0 }
 0x14c   :  { %v576_v5 = vsel %vm129_vm13, %v572_v60, -inf  ;;  %v666_v7 = vsel %vm129_vm13, %v662_v61, -inf  ;;  %v753_v59 = vsel %vm129_vm13, %v749_v63, -inf  ;;  %v517_v8 = vsel %vm504_vm12, 0.0, %v513_v62 }
 0x14d   :  { %v577_v9 = vmax.f32 %v575_v58, %v576_v5  ;;  %v667_v10 = vmax.f32 %v665_v43, %v666_v7  ;;  %v754_v11 = vmax.f32 %v752_v52, %v753_v59  ;;  %v525_v14 = vadd.f32 %v521_v27, %v517_v8 }
 0x14e   :  { %v532_v53 = vadd.f32 %v1397_v57, %v524_v2 }
 0x14f   :  { %v578_v16 = vrot.slane %v577_v9, 4  ;;  %v668_v6 = vrot.slane %v667_v10, 4  ;;  %v755_v3 = vrot.slane %v754_v11, 4  ;;  %v533_v18 = vadd.f32 %v1397_v57, %v525_v14  ;;  %v898_v57 = vld [vmem:[%s1511_s8 + $0x40] sm:$0xff] }
 0x150   :  { %v569_v21 = vadd.f32 %v1382_v40, %v532_v53  ;;  %v659_v22 = vadd.f32 %v1406_v4, %v532_v53  ;;  %v746_v23 = vadd.f32 %v737_v15, %v532_v53  ;;  %797 = vmatpush.msrb.mxu2 %v898_v57 }
 0x151   :  { %v579_v28 = vmax.f32 %v577_v9, %v578_v16  ;;  %v669_v29 = vmax.f32 %v667_v10, %v668_v6  ;;  %v756_v51 = vmax.f32 %v754_v11, %v755_v3  ;;  %v570_v19 = vadd.f32 %v1386_v45, %v533_v18 }
 0x152   :  { %v573_v13 = vmax.f32 %v569_v21, 0.0  ;;  %v660_v25 = vadd.f32 %v1432_v32, %v533_v18  ;;  %v663_v30 = vmax.f32 %v659_v22, 0.0  ;;  %v747_v31 = vadd.f32 %v742_v26, %v533_v18  ;;  %v927_v22 = vld [vmem:[%s1510_s9] ss:$0 sm:$0xff] }
 0x153   :  { %v580_v40 = vrot.slane %v579_v28, 2  ;;  %v670_v4 = vrot.slane %v669_v29, 2  ;;  %v574_v33 = vmax.f32 %v570_v19, 0.0  ;;  %v750_v17 = vmax.f32 %v746_v23, 0.0 }
 0x154   :  { %v584_v34 = vsel %vm129_vm13, %v573_v13, -inf  ;;  %v664_v12 = vmax.f32 %v660_v25, 0.0  ;;  %v674_v35 = vsel %vm129_vm13, %v663_v30, -inf  ;;  %v757_v36 = vrot.slane %v756_v51, 2 }
 0x155   :  { %v581_v45 = vmax.f32 %v579_v28, %v580_v40  ;;  %v585_v37 = vsel %vm129_vm13, %v574_v33, -inf  ;;  %v751_v39 = vmax.f32 %v747_v31, 0.0  ;;  %v761_v41 = vsel %vm129_vm13, %v750_v17, -inf }
 0x156   :  { %v586_v38 = vmax.f32 %v584_v34, %v585_v37  ;;  %v675_v32 = vsel %vm129_vm13, %v664_v12, -inf  ;;  %v671_v42 = vmax.f32 %v669_v29, %v670_v4  ;;  %v758_v55 = vmax.f32 %v756_v51, %v757_v36 }
 0x157   :  { %v676_v44 = vmax.f32 %v674_v35, %v675_v32  ;;  %v762_v48 = vsel %vm129_vm13, %v751_v39, -inf  ;;  %v582_v54 = vrot.slane %v581_v45, 1 }
 0x158   :  { %v587_v46 = vrot.slane %v586_v38, 4  ;;  %v763_v50 = vmax.f32 %v761_v41, %v762_v48  ;;  %v672_v24 = vrot.slane %v671_v42, 1  ;;  %v759_v0 = vrot.slane %v758_v55, 1 }
 0x159   :  { %v677_v49 = vrot.slane %v676_v44, 4  ;;  %v583_v52 = vmax.f32 %v581_v45, %v582_v54 }
 0x15a   :  { %v588_v56 = vmax.f32 %v586_v38, %v587_v46  ;;  %v764_v27 = vrot.slane %v763_v50, 4  ;;  %v673_v5 = vmax.f32 %v671_v42, %v672_v24  ;;  %v760_v10 = vmax.f32 %v758_v55, %v759_v0 }
 0x15b   :  { %v678_v58 = vmax.f32 %v676_v44, %v677_v49  ;;  %928 = vtanh.f32 %v583_v52 }
 0x15c   :  { %v589_v60 = vrot.slane %v588_v56, 2  ;;  %v765_v63 = vmax.f32 %v763_v50, %v764_v27  ;;  %930 = vtanh.f32 %v673_v5 }
 0x15d   :  { %v679_v61 = vrot.slane %v678_v58, 2 }
 0x15e   :  { %v590_v43 = vmax.f32 %v588_v56, %v589_v60  ;;  %v766_v2 = vrot.slane %v765_v63, 2 }
 0x15f   :  { %v680_v62 = vmax.f32 %v678_v58, %v679_v61 }
 0x160   :  { %v591_v7 = vrot.slane %v590_v43, 1  ;;  %v767_v8 = vmax.f32 %v765_v63, %v766_v2 }
 0x161   :  { %v681_v59 = vrot.slane %v680_v62, 1  ;;  %v929_v1 = vpop.eup %928 }
 0x162   :  { %v592_v9 = vmax.f32 %v590_v43, %v591_v7  ;;  %v768_v11 = vrot.slane %v767_v8, 1  ;;  %v931_v53 = vpop.eup %930 }
 0x163   :  { %v682_v14 = vmax.f32 %v680_v62, %v681_v59 }
 0x164   :  { %932 = vtanh.f32 %v592_v9  ;;  %v769_v47 = vmax.f32 %v767_v8, %v768_v11 }
 0x165   :  { %934 = vtanh.f32 %v682_v14 }
 0x166   :  { %936 = vtanh.f32 %v760_v10 }
 0x167   :  { %938 = vtanh.f32 %v769_v47 }
 0x16a   :  { %v933_v15 = vpop.eup %932 }
 0x16b   :  { %v935_v16 = vpop.eup %934  ;;  %v602_v6 = vsel %vm601_vm14, %v933_v15, %v929_v1 }
 0x16c   :  { %v937_v3 = vpop.eup %936  ;;  %892 = vmatmul.msk.f32.vlgmr.msra.gmra.mxu2 %vm129_vm13, %v602_v6  ;;  %v692_v18 = vsel %vm601_vm14, %v935_v16, %v931_v53 }
 0x16d   :  { %v939_v20 = vpop.eup %938  ;;  %897 = vmatmul.msk.f32.vlgmr.msrb.gmra.mxu3 %vm129_vm13, %v692_v18 }
 0x16e   :  { %v779_v21 = vsel %vm601_vm14, %v939_v20, %v937_v3 }
 0x174   :  { %902 = vmatmul.msk.f32.vlgmr.msrb.gmra.mxu2 %vm129_vm13, %v779_v21 }
 0x1ef   :  { %v622_v23 = vpop.f32.mrf.mxu2 }
 0x1f0   :  { %v628_v26 = vadd.f32 %v927_v22, %v622_v23  ;;  %v712_v28 = vpop.f32.mrf.mxu3 }
 0x1f2   :  { %v715_v29 = vadd.f32 %v712_v28, %v628_v26 }
 0x1f7   :  { %v799_v51 = vpop.f32.mrf.mxu2 }
 0x1f8   :  { %v802_v19 = vadd.f32 %v799_v51, %v715_v29 }
 0x1fa   :  { %803 = vst [vmem:[%s1512_s10] sm:$0x3] %v802_v19 }

</bundles_post_ra>
